<compile_context>
chip_gen: v6e
topology: v6e:2x2x1
jax: 0.10.0
libtpu: 0.0.40
codegen_flags: <defaults>
</compile_context>

<pallas_src>
import jax
import jax.numpy as jnp
from jax.experimental import pallas as pl
from jax.experimental.pallas import tpu as pltpu


_LN_EPS = 1e-6


def _cls_layer_img_kernel(x_ref, w_ref, b_ref, o_ref):
    """Fused TRAR LayerNorm (ddof=1, eps on std) + projection.

    gamma/beta are pre-folded into w_ref / b_ref by the wrapper, so only
    (x - mean) * inv_std is computed here before the MXU matmul.
    """
    x = x_ref[...].astype(jnp.float32)                         # (TN, D)
    d = x.shape[-1]

    # --- LayerNorm statistics (unbiased std, eps added to std) ---
    mean = jnp.mean(x, axis=-1, keepdims=True)                  # (TN, 1)
    diff = x - mean
    var_unbiased = jnp.sum(diff * diff, axis=-1, keepdims=True) * (1.0 / (d - 1))
    inv = 1.0 / (jnp.sqrt(var_unbiased) + _LN_EPS)              # per-row, exact
    xn = (diff * inv).astype(w_ref.dtype)                       # bf16 MXU feed on v6e/v7x

    # --- Projection on the MXU (gamma folded into w, beta into bias) ---
    out = jnp.dot(xn, w_ref[...], preferred_element_type=jnp.float32)
    out = out + b_ref[...].astype(jnp.float32)
    o_ref[...] = out.astype(o_ref.dtype)


def prepare_params(params, mxu_dtype=jnp.bfloat16):
    """One-time fold of the LN affine into the projection weight/bias.

    (gamma * xhat + beta) @ W.T + b == xhat @ (gamma[:,None] * W.T) + (beta @ W.T + b)

    Done in f32 once (outside the per-step forward); the effective weight is
    stored in the dtype that will be fed to the MXU (bf16 by default) so it is
    streamed / held in VMEM at half width.
    """
    gamma = params["ln_gamma"].astype(jnp.float32)               # (D,)
    beta = params["ln_beta"].astype(jnp.float32)                 # (D,)
    weight = params["proj_w"].astype(jnp.float32)                # PyTorch Linear: (O, D)
    bias = params["proj_b"].astype(jnp.float32)                  # (O,)
    out_dim, _ = weight.shape

    w_eff = gamma[:, None] * weight.T                            # (D, O), lane-dense rhs
    b_eff = beta @ weight.T + bias                               # (O,)

    # Pad output features to a multiple of 128 -> unmasked lane-dense stores.
    o_pad = max(128, ((out_dim + 127) // 128) * 128)
    if o_pad != out_dim:
        w_eff = jnp.pad(w_eff, ((0, 0), (0, o_pad - out_dim)))
        b_eff = jnp.pad(b_eff, (0, o_pad - out_dim))

    return {
        "w_eff": w_eff.astype(mxu_dtype),                        # (D, O_pad)
        "b_eff": b_eff.reshape(1, o_pad),                        # (1, O_pad) f32
        "out_dim": out_dim,
    }


def cls_layer_img_forward(lang_feat, img_feat, eff_params):
    """Forward pass: proj(LayerNorm(img_feat)). lang_feat unused (API parity)."""
    del lang_feat
    w_eff = eff_params["w_eff"]
    b_eff = eff_params["b_eff"]
    out_dim = int(eff_params["out_dim"])

    B, S, D = img_feat.shape
    N = B * S
    O_pad = w_eff.shape[1]
    x2d = img_feat.reshape(N, D)

    x_bytes = x2d.dtype.itemsize
    w_bytes = w_eff.dtype.itemsize
    o_bytes = img_feat.dtype.itemsize

    # Row tile: 512 (multiple of 8) amortizes per-step overhead well; full N
    # when the problem is small.
    TN = N if N <= 512 else 512

    def vmem_needed(to):
        # double-buffered pipeline blocks + f32 intermediates + headroom
        blocks = 2 * (TN * D * x_bytes + D * to * w_bytes + TN * to * o_bytes + to * 4)
        interm = 3 * TN * D * 4 + TN * to * 4
        return blocks + interm + (4 << 20)

    if vmem_needed(O_pad) <= (40 << 20):
        # Common path: single output block => constant-index weight block =>
        # the full weight is DMA'd from HBM exactly once and stays VMEM-resident
        # for the whole row sweep. Fits comfortably in v7x's 64 MiB VMEM.
        grid = (pl.cdiv(N, TN),)
        in_specs = [
            pl.BlockSpec((TN, D), lambda i: (i, 0)),             # activations: row-tiled
            pl.BlockSpec((D, O_pad), lambda i: (0, 0)),          # weight: constant index (resident)
            pl.BlockSpec((1, O_pad), lambda i: (0, 0)),          # folded bias: resident
        ]
        out_specs = pl.BlockSpec((TN, O_pad), lambda i: (i, 0))
        dim_sem = ("parallel",)                                  # rows sharded across TCs
        vmem_bytes = vmem_needed(O_pad)
    else:
        # Fallback for very large heads: tile O but keep the ROW axis innermost,
        # so each (D, TO) weight block is loaded once and revisited across the
        # row sweep (total weight HBM traffic stays ~1x). LN is recomputed per
        # O-tile, which is the cheaper duplication when the weight is huge.
        TO = 2048
        grid = (pl.cdiv(O_pad, TO), pl.cdiv(N, TN))
        in_specs = [
            pl.BlockSpec((TN, D), lambda j, i: (i, 0)),
            pl.BlockSpec((D, TO), lambda j, i: (0, j)),
            pl.BlockSpec((1, TO), lambda j, i: (0, j)),
        ]
        out_specs = pl.BlockSpec((TN, TO), lambda j, i: (i, j))
        dim_sem = ("arbitrary", "parallel")
        vmem_bytes = vmem_needed(TO)

    out2d = pl.pallas_call(
        _cls_layer_img_kernel,
        out_shape=jax.ShapeDtypeStruct((N, O_pad), img_feat.dtype),
        grid=grid,
        in_specs=in_specs,
        out_specs=out_specs,
        compiler_params=pltpu.CompilerParams(
            dimension_semantics=dim_sem,
            vmem_limit_bytes=int(vmem_bytes),
        ),
    )(x2d, w_eff, b_eff)

    return out2d[:, :out_dim].reshape(B, S, out_dim)


def _reference(lang_feat, img_feat, params):
    # Pure-JAX reference of the PyTorch forward (unfused LN + Linear).
    del lang_feat
    x = img_feat.astype(jnp.float32)
    mean = jnp.mean(x, axis=-1, keepdims=True)
    var = jnp.sum((x - mean) ** 2, axis=-1, keepdims=True) / (x.shape[-1] - 1)
    xn = params["ln_gamma"] * (x - mean) / (jnp.sqrt(var) + _LN_EPS) + params["ln_beta"]
    return xn @ params["proj_w"].T + params["proj_b"]


if __name__ == "__main__":
    key = jax.random.PRNGKey(0)
    k_lang, k_img, k_w, k_b, k_g, k_bb = jax.random.split(key, 6)

    B, S, D, O = 2, 8, 32, 16        # batch, seq (flattened img grid), hidden, classes
    lang_feat = jax.random.normal(k_lang, (B, S, D), jnp.float32)   # unused by forward
    img_feat = jax.random.normal(k_img, (B, S, D), jnp.float32)

    params = {
        # Non-trivial gamma/beta so the folded LN-affine path is exercised.
        "ln_gamma": 1.0 + 0.1 * jax.random.normal(k_g, (D,), jnp.float32),
        "ln_beta": 0.1 * jax.random.normal(k_bb, (D,), jnp.float32),
        "proj_w": jax.random.normal(k_w, (O, D), jnp.float32) * 0.02,
        "proj_b": jax.random.normal(k_b, (O,), jnp.float32) * 0.01,
    }

    ref = _reference(lang_feat, img_feat, params)

    # f32 MXU path: tight tolerance (matches v5e-class precision needs).
    eff_f32 = prepare_params(params, mxu_dtype=jnp.float32)
    out_f32 = jax.block_until_ready(cls_layer_img_forward(lang_feat, img_feat, eff_f32))
    assert out_f32.shape == (B, S, O)
    assert jnp.allclose(out_f32, ref, atol=1e-4, rtol=1e-4)

    # bf16 MXU path (default for v6e/v7x): bf16 operands, f32 accumulation.
    eff_bf16 = prepare_params(params, mxu_dtype=jnp.bfloat16)
    out_bf16 = jax.block_until_ready(cls_layer_img_forward(lang_feat, img_feat, eff_bf16))
    assert out_bf16.shape == (B, S, O)
    assert jnp.allclose(out_bf16, ref, atol=2e-2, rtol=2e-2)

    print("KERNEL_OK")
</pallas_src>

<mosaic_0001>
module attributes {stable_mosaic.version = 11 : i64} {
  func.func @_cls_layer_img_kernel(%arg0: i32, %arg1: memref<16x32xf32, #tpu.memory_space<vmem>>, %arg2: memref<32x128xf32, #tpu.memory_space<vmem>>, %arg3: memref<1x128xf32, #tpu.memory_space<vmem>>, %arg4: memref<16x128xf32, #tpu.memory_space<vmem>>) attributes {dimension_semantics = [#tpu.dimension_semantics<parallel>], iteration_bounds = array<i64: 1>, scalar_prefetch = 0 : i64, scratch_operands = 0 : i64, tpu.core_type = #tpu.core_type<tc>, window_params = [{transform_indices = @transform_0, window_bounds = array<i64: 16, 32>}, {pipeline_mode = #tpu.pipeline_mode<synchronous>, transform_indices = @transform_1, window_bounds = array<i64: 32, 128>}, {pipeline_mode = #tpu.pipeline_mode<synchronous>, transform_indices = @transform_2, window_bounds = array<i64: 1, 128>}, {transform_indices = @transform_3, window_bounds = array<i64: 16, 128>}]} {
    %c0 = arith.constant 0 : index
    %c0_0 = arith.constant 0 : index
    %0 = vector.load %arg1[%c0, %c0_0] : memref<16x32xf32, #tpu.memory_space<vmem>>, vector<16x32xf32>
    %cst = arith.constant dense<0.000000e+00> : vector<16xf32>
    %1 = vector.multi_reduction <add>, %0, %cst [1] : vector<16x32xf32> to vector<16xf32>
    %2 = vector.shape_cast %1 : vector<16xf32> to vector<16x1xf32>
    %cst_1 = arith.constant 3.200000e+01 : f32
    %3 = vector.broadcast %cst_1 : f32 to vector<16x1xf32>
    %4 = arith.divf %2, %3 : vector<16x1xf32>
    %5 = vector.broadcast %4 : vector<16x1xf32> to vector<16x32xf32>
    %6 = arith.subf %0, %5 : vector<16x32xf32>
    %7 = arith.mulf %6, %6 : vector<16x32xf32>
    %cst_2 = arith.constant dense<0.000000e+00> : vector<16xf32>
    %8 = vector.multi_reduction <add>, %7, %cst_2 [1] : vector<16x32xf32> to vector<16xf32>
    %9 = vector.shape_cast %8 : vector<16xf32> to vector<16x1xf32>
    %cst_3 = arith.constant 0.0322580636 : f32
    %10 = vector.broadcast %cst_3 : f32 to vector<16x1xf32>
    %11 = arith.mulf %9, %10 : vector<16x1xf32>
    %12 = math.sqrt %11 : vector<16x1xf32>
    %cst_4 = arith.constant 9.99999997E-7 : f32
    %13 = vector.broadcast %cst_4 : f32 to vector<16x1xf32>
    %14 = arith.addf %12, %13 : vector<16x1xf32>
    %cst_5 = arith.constant 1.000000e+00 : f32
    %15 = vector.broadcast %cst_5 : f32 to vector<16x1xf32>
    %16 = arith.divf %15, %14 : vector<16x1xf32>
    %17 = vector.broadcast %16 : vector<16x1xf32> to vector<16x32xf32>
    %18 = arith.mulf %6, %17 : vector<16x32xf32>
    %c0_6 = arith.constant 0 : index
    %c0_7 = arith.constant 0 : index
    %19 = vector.load %arg2[%c0_6, %c0_7] : memref<32x128xf32, #tpu.memory_space<vmem>>, vector<32x128xf32>
    %cst_8 = arith.constant dense<0.000000e+00> : vector<16x128xf32>
    %20 = tpu.matmul %18, %19, %cst_8 {dimension_numbers = #tpu.dot_dimension_numbers<[1], [0], [0], [1], [0, 0, 1, 1], [], []>} : vector<16x32xf32>, vector<32x128xf32>, vector<16x128xf32> -> vector<16x128xf32>
    %c0_9 = arith.constant 0 : index
    %c0_10 = arith.constant 0 : index
    %21 = vector.load %arg3[%c0_9, %c0_10] : memref<1x128xf32, #tpu.memory_space<vmem>>, vector<1x128xf32>
    %22 = vector.broadcast %21 : vector<1x128xf32> to vector<16x128xf32>
    %23 = arith.addf %20, %22 : vector<16x128xf32>
    %c0_11 = arith.constant 0 : index
    %c0_12 = arith.constant 0 : index
    %24 = vector.load %arg4[%c0_11, %c0_12] : memref<16x128xf32, #tpu.memory_space<vmem>>, vector<16x128xf32>
    tpu.vector_store %arg4[%c0_11, %c0_12], %23 {strides = array<i32>} : memref<16x128xf32, #tpu.memory_space<vmem>>, vector<16x128xf32>,
    return
  }
  func.func @transform_0(%arg0: i32) -> (i32, i32) {
    %c0_i32 = arith.constant 0 : i32
    %c0_i32_0 = arith.constant 0 : i32
    return %arg0, %c0_i32 : i32, i32
  }
  func.func @transform_1(%arg0: i32) -> (i32, i32) {
    %c0_i32 = arith.constant 0 : i32
    %c0_i32_0 = arith.constant 0 : i32
    %c0_i32_1 = arith.constant 0 : i32
    return %c0_i32, %c0_i32_0 : i32, i32
  }
  func.func @transform_2(%arg0: i32) -> (i32, i32) {
    %c0_i32 = arith.constant 0 : i32
    %c0_i32_0 = arith.constant 0 : i32
    %c0_i32_1 = arith.constant 0 : i32
    return %c0_i32, %c0_i32_0 : i32, i32
  }
  func.func @transform_3(%arg0: i32) -> (i32, i32) {
    %c0_i32 = arith.constant 0 : i32
    %c0_i32_0 = arith.constant 0 : i32
    return %arg0, %c0_i32 : i32, i32
  }
}

</mosaic_0001>

<bundles_post_ra>
// kernel: tpu_custom_call.1
= control target key start
LH: loop header
LB: loop body
LE: loop exit
PB: predicated region body
PF: predicated region fallthrough
CT: control target
= control target key end

     0   :  { %8 = vsyncpa [#allocation3], 0  ;;  %s352_s0 = inlined_call_operand.hbm [shape: f32[16,32], index: 0, kind: input, shape index: {}]   ;;  %s353_s1 = inlined_call_operand.hbm [shape: f32[32,128], index: 1, kind: input, shape index: {}]   ;;  %s354_s2 = inlined_call_operand.vmem [shape: f32[1,128], index: 2, kind: input, shape index: {}]   ;;  %s355_s3 = inlined_call_operand.hbm [shape: f32[16,128], index: 3, kind: output, shape index: {}]  }
   0x1   :  { %9 = vsyncpa [#allocation6], 0 }
   0x2   :  { %10 = vsyncpa [#allocation4], 0  ;;  %s300_s12 = smov [#allocation2]  }
   0x3   :  { %s16_s13 = sshll.u32 %s300_s12, 4  ;;  %s17_s13 = int_to_ptr.vmem [resolvable:$true] %s16_s13 }
   0x4   :  { %s242_s14 = scalar_lea.vmem %s17_s13, 256  ;;  %p247_p1 = scmp.lt.s32.totalorder %s17_s13, %s17_s13 }
   0x5   :  { %p243_p0 = scmp.ne.s32.totalorder %s17_s13, %s242_s14  ;;  %p248_p2 = scmp.lt.s32.totalorder %s242_s14, %s242_s14 }
   0x7   :  { %p249_p3 = por %p248_p2, %p247_p1 }
   0x9   :  { %p250_p4 = pnand %p249_p3, %p243_p0 }
   0xb   :  { %253 = shalt.err (!%p250_p4)
}
   0xc   :  { %s301_s15 = smov 128   ;;  %s302_s16 = smov 8  }
   0xd   :  { %22 = dma.hbm_to_vmem [thread:$0]  %s352_s0, 256, %s17_s13, [#allocation3], %s301_s15, %s301_s15, %s302_s16  }
   0xe   :  { %s303_s19 = smov [#allocation5]  }
   0xf   :  { %s28_s20 = sshll.u32 %s303_s19, 4  ;;  %s29_s20 = int_to_ptr.vmem [resolvable:$true] %s28_s20 }
  0x10   :  { %s262_s21 = scalar_lea.vmem %s29_s20, 512  ;;  %p267_p6 = scmp.lt.s32.totalorder %s29_s20, %s29_s20 }
  0x11   :  { %p263_p5 = scmp.ne.s32.totalorder %s29_s20, %s262_s21  ;;  %p268_p7 = scmp.lt.s32.totalorder %s262_s21, %s262_s21 }
  0x13   :  { %p269_p8 = por %p268_p7, %p267_p6 }
  0x15   :  { %p270_p9 = pnand %p269_p8, %p263_p5 }
  0x17   :  { %273 = shalt.err (!%p270_p9)
}
  0x18   :  { %34 = dma.hbm_to_vmem [thread:$0]  %s353_s1, 512, %s29_s20, [#allocation6], %s301_s15, %s301_s15, %s302_s16  }
  0x19   :  { %294 = dma.done.wait [#allocation3], 256  }
  0x1a   :  { %295 = vsyncadd [#allocation3], 4294967040 }
  0x1b   :  { %296 = dma.done.wait [#allocation6], 512  }
  0x1c   :  { %297 = vsyncadd [#allocation6], 4294966784  ;;  %vm45_vm0 = vcmask 261120   ;;  %v43_v0 = vld [vmem:[#allocation2] sm:$0xff]  ;;  %v44_v1 = vld [vmem:[#allocation2 + $0x8] sm:$0xff]  ;;  %s304_s24 = smov [#allocation7]  }
  0x1d   :  { %v46_v2 = vsel %vm45_vm0, %v43_v0, 0.0  ;;  %v49_v3 = vsel %vm45_vm0, %v44_v1, 0.0  ;;  %v92_v14 = vld [vmem:[#allocation5 + $0x18] sm:$0xff]  ;;  %v91_v15 = vld [vmem:[#allocation5 + $0x10] sm:$0xff]  ;;  %v90_v16 = vld [vmem:[#allocation5 + $0x8] sm:$0xff]  ;;  %s188_s25 = sshll.u32 %s304_s24, 4  ;;  %s189_s25 = int_to_ptr.vmem [resolvable:$true] %s188_s25 }
  0x1e   :  { %47 = vadd.xlane.f32.xlu0 %v46_v2  ;;  %210 = vmatprep.subr.mxu0 %v92_v14  ;;  %v89_v17 = vld [vmem:[#allocation5] sm:$0xff]  ;;  %v201_v38 = vld [vmem:[%s354_s2] ss:$0 sm:$0xff]  ;;  %s274_s26 = scalar_lea.vmem %s189_s25, 256  ;;  %p279_p11 = scmp.lt.s32.totalorder %s189_s25, %s189_s25 }
  0x1f   :  { %211 = vmatpush3.msra.mxu0 %v92_v14  ;;  %p275_p10 = scmp.ne.s32.totalorder %s189_s25, %s274_s26  ;;  %p280_p12 = scmp.lt.s32.totalorder %s274_s26, %s274_s26 }
  0x20   :  { %212 = vmatprep.subr.mxu0 %v91_v15 }
  0x21   :  { %213 = vmatpush3.msra.mxu0 %v91_v15  ;;  %p281_p13 = por %p280_p12, %p279_p11 }
  0x22   :  { %50 = vadd.xlane.f32.xlu0 %v49_v3  ;;  %214 = vmatprep.subr.mxu0 %v90_v16 }
  0x23   :  { %215 = vmatpush3.msra.mxu0 %v90_v16  ;;  %p282_p0 = pnand %p281_p13, %p275_p10 }
  0x24   :  { %216 = vmatprep.subr.mxu0 %v89_v17 }
  0x25   :  { %217 = vmatpush3.msra.mxu0 %v89_v17 }
  0xa7   :  { %v48_v4 = vpop.xlane.xlu0 %47 }
  0xa8   :  { %v53_v5 = vmul.f32 0.03125, %v48_v4 }
  0xaa   :  { %v55_v6 = vsub.f32 %v43_v0, %v53_v5 }
  0xab   :  { %v51_v7 = vpop.xlane.xlu0 %50 }
  0xac   :  { %v54_v8 = vmul.f32 0.03125, %v51_v7  ;;  %v57_v9 = vmul.f32 %v55_v6, %v55_v6 }
  0xae   :  { %v56_v10 = vsub.f32 %v44_v1, %v54_v8  ;;  %v59_v11 = vsel %vm45_vm0, %v57_v9, 0.0 }
  0xaf   :  { %60 = vadd.xlane.f32.xlu1 %v59_v11 }
  0xb0   :  { %v58_v12 = vmul.f32 %v56_v10, %v56_v10 }
  0xb2   :  { %v62_v13 = vsel %vm45_vm0, %v58_v12, 0.0 }
  0xb3   :  { %63 = vadd.xlane.f32.xlu1 %v62_v13 }
 0x138   :  { %v61_v18 = vpop.xlane.xlu1 %60 }
 0x139   :  { %v65_v19 = vmul.f32 0.032258064, %v61_v18 }
 0x13b   :  { %226 = vrsqrt.f32 %v65_v19  ;;  %vm69_vm1 = vcmp.eq.f32.partialorder %v65_v19, inf  ;;  %v72_v24 = vand.u32 2147483648, %v65_v19  ;;  %vm71_vm2 = vcmp.eq.f32.partialorder %v65_v19, 0.0 }
 0x13c   :  { %v64_v20 = vpop.xlane.xlu1 %63 }
 0x13d   :  { %v66_v21 = vmul.f32 0.032258064, %v64_v20 }
 0x13f   :  { %228 = vrsqrt.f32 %v66_v21  ;;  %vm76_vm3 = vcmp.eq.f32.partialorder %v66_v21, inf  ;;  %v79_v30 = vand.u32 2147483648, %v66_v21  ;;  %vm78_vm4 = vcmp.eq.f32.partialorder %v66_v21, 0.0 }
 0x148   :  { %v227_v22 = vpop.eup %226 }
 0x149   :  { %v68_v23 = vmul.f32 %v227_v22, %v65_v19 }
 0x14b   :  { %v70_v25 = vsel %vm69_vm1, %v65_v19, %v68_v23 }
 0x14c   :  { %v229_v26 = vpop.eup %228  ;;  %v73_v27 = vsel %vm71_vm2, %v72_v24, %v70_v25 }
 0x14d   :  { %v75_v28 = vmul.f32 %v229_v26, %v66_v21  ;;  %v81_v29 = vadd.f32 1e-06, %v73_v27 }
 0x14f   :  { %v77_v31 = vsel %vm76_vm3, %v66_v21, %v75_v28  ;;  %230 = vrcp.f32 %v81_v29 }
 0x150   :  { %v80_v32 = vsel %vm78_vm4, %v79_v30, %v77_v31 }
 0x151   :  { %v82_v33 = vadd.f32 1e-06, %v80_v32 }
 0x153   :  { %232 = vrcp.f32 %v82_v33 }
 0x15c   :  { %v231_v34 = vpop.eup %230 }
 0x15d   :  { %v87_v35 = vmul.f32 %v231_v34, %v55_v6 }
 0x15f   :  { %218 = vmatprep.mubr.msk.f32.mxu0 %vm45_vm0, %v87_v35 }
 0x160   :  { %v233_v36 = vpop.eup %232 }
 0x161   :  { %v88_v37 = vmul.f32 %v233_v36, %v56_v10 }
 0x163   :  { %219 = vmatmul.mubr.msk.f32.vlgmr.msra.gmra.mxu0 %vm45_vm0, %v88_v37 }
 0x223   :  { %v220_v39 = vpop.f32.mrf.mxu0 }
 0x224   :  { %v178_v40 = vadd.f32 %v220_v39, %v201_v38 }
 0x225   :  { %v172_v41 = vpop.f32.mrf.mxu0 }
 0x226   :  { %182 = vst [vmem:[#allocation7 + $0x8] sm:$0xff] %v178_v40  ;;  %v173_v42 = vadd.f32 %v201_v38, %v172_v41 }
 0x228   :  { %181 = vst [vmem:[#allocation7] sm:$0xff] %v173_v42 }
 0x229   :  { %285 = shalt.err (!%p282_p0)
}
 0x22a   :  { %194 = dma.vmem_to_hbm [thread:$0]  %s189_s25, 256, %s355_s3, [#allocation4], %s301_s15, %s301_s15, %s302_s16  }
 0x22b   :  { %298 = dma.done.wait [#allocation4], 256  }
 0x22c   :  { %299 = vsyncadd [#allocation4], 4294967040 }
 0x22d   :  { %198 = vsyncpa [#allocation3], 1 }
 0x22e   :  { %199 = vsyncpa [#allocation6], 1 }
 0x22f   :  { %200 = vsyncpa [#allocation4], 1 }

</bundles_post_ra>
